<compile_context>
chip_gen: v6e
topology: v6e:2x2x1
jax: 0.10.0
libtpu: 0.0.40
codegen_flags: <defaults>
</compile_context>

<pallas_src>
import functools
import math

import jax
import jax.numpy as jnp
from jax.experimental import pallas as pl
from jax.experimental.pallas import tpu as pltpu


def _round_up(x, m):
    return ((x + m - 1) // m) * m


def _linear_kernel(x_ref, w_ref, b_ref, o_ref, acc_ref, *, apply_relu):
    """o[tm, tn] = sum_k x[tm, tk] @ w[tk, tn] + b  (optionally ReLU-ed)."""
    @pl.when(pl.program_id(2) == 0)
    def _():
        acc_ref[...] = jnp.zeros_like(acc_ref)

    acc_ref[...] += jnp.dot(
        x_ref[...], w_ref[...], preferred_element_type=jnp.float32
    )

    @pl.when(pl.program_id(2) == pl.num_programs(2) - 1)
    def _():
        out = acc_ref[...] + b_ref[...].astype(jnp.float32)  # (1, tn) broadcast
        if apply_relu:
            out = jnp.maximum(out, 0.0)
        o_ref[...] = out.astype(o_ref.dtype)


def _choose_tiles(mp, kp, np_, itemsize, vmem_budget=24 * 1024 * 1024):
    """Pick (8,128)-aligned tiles that fit a conservative VMEM budget (v7x-safe)."""
    # bf16 params: wider N/K tiles (MXU is 2x256^2 on v6e/v7x); f32: 256-wide.
    if itemsize <= 2:
        tm, tn, tk = 256, 512, 512
    else:
        tm, tn, tk = 256, 256, 256
    tm = min(tm, mp)   # mp is a multiple of 8  -> tm stays a multiple of 8
    tn = min(tn, np_)  # np_, kp are multiples of 128
    tk = min(tk, kp)

    def vmem_bytes(tm_, tn_, tk_):
        # double-buffered x, w, out, bias tiles + f32 accumulator scratch
        return (2 * (tm_ * tk_ + tk_ * tn_ + tm_ * tn_ + tn_) * itemsize
                + tm_ * tn_ * 4)

    while vmem_bytes(tm, tn, tk) > vmem_budget and tk > 128:
        tk = max(128, tk // 2)
    while vmem_bytes(tm, tn, tk) > vmem_budget and tn > 128:
        tn = max(128, tn // 2)
    return tm, tn, tk


@functools.partial(jax.jit, static_argnames=("apply_relu",))
def pallas_linear(x, w_kn, b, *, apply_relu=False):
    """y = x @ w_kn + b (optionally ReLU). w_kn is already [K, N] (transposed at init)."""
    m, k = x.shape
    k2, n = w_kn.shape
    assert k == k2, "dim_in mismatch"
    assert b.shape == (n,)

    # Pad to the (8, 128) layout grid: lane-dense output stores, legal block shapes.
    mp = _round_up(m, 8)
    kp = _round_up(k, 128)
    np_ = _round_up(n, 128)
    if (mp, kp) != (m, k):
        x = jnp.pad(x, ((0, mp - m), (0, kp - k)))
    if (kp, np_) != (k, n):
        w_kn = jnp.pad(w_kn, ((0, kp - k), (0, np_ - n)))
    if np_ != n:
        b = jnp.pad(b, (0, np_ - n))
    b2 = b.reshape(1, np_)

    tm, tn, tk = _choose_tiles(mp, kp, np_, x.dtype.itemsize)
    grid = (pl.cdiv(mp, tm), pl.cdiv(np_, tn), pl.cdiv(kp, tk))

    itemsize = x.dtype.itemsize
    cost = pl.CostEstimate(
        flops=2 * mp * np_ * kp,
        transcendentals=0,
        bytes_accessed=(mp * kp + kp * np_ + np_ + mp * np_) * itemsize,
    )

    out = pl.pallas_call(
        functools.partial(_linear_kernel, apply_relu=apply_relu),
        out_shape=jax.ShapeDtypeStruct((mp, np_), x.dtype),
        grid_spec=pltpu.PrefetchScalarGridSpec(
            num_scalar_prefetch=0,
            grid=grid,
            in_specs=[
                pl.BlockSpec((tm, tk), lambda i, j, kk: (i, kk)),
                pl.BlockSpec((tk, tn), lambda i, j, kk: (kk, j)),
                pl.BlockSpec((1, tn), lambda i, j, kk: (0, j)),
            ],
            out_specs=pl.BlockSpec((tm, tn), lambda i, j, kk: (i, j)),
            scratch_shapes=[pltpu.VMEM((tm, tn), jnp.float32)],
        ),
        compiler_params=pltpu.CompilerParams(
            dimension_semantics=("parallel", "parallel", "arbitrary"),
            vmem_limit_bytes=32 * 1024 * 1024,
        ),
        cost_estimate=cost,
    )(x, w_kn, b2)

    if (mp, np_) != (m, n):
        out = out[:m, :n]
    return out


def init_mlp_params(key, dim_in, dim_out, dim_inner=None, num_layers=2,
                    final_act=False, dtype=jnp.float32):
    """Mirror MLP(dim_in, dim_out, bias=True, dim_inner, num_layers, final_act).

    Weights are transposed to [K, N] once here (outside jit) so the hot path
    never re-transposes them.
    """
    dim_inner = dim_in if dim_inner is None else dim_inner
    layers = []

    # GeneralMultiLayer(num_layers - 1, dim_in, dim_inner, dim_inner, final_act)
    n_gml = num_layers - 1
    for i in range(n_gml):
        d_in = dim_in if i == 0 else dim_inner
        d_out = dim_inner
        has_act = final_act if i == n_gml - 1 else True
        key, kw, kb = jax.random.split(key, 3)
        bound = 1.0 / math.sqrt(d_in)
        w = jax.random.uniform(kw, (d_out, d_in), minval=-bound, maxval=bound,
                               dtype=dtype)
        b = jax.random.uniform(kb, (d_out,), minval=-bound, maxval=bound,
                               dtype=dtype)
        # TODO(synk): nn.Dropout(p=0.2) is identity in eval mode; training-mode
        # stochastic dropout is not implemented here.
        layers.append({"w_kn": jnp.asarray(w.T), "b": b, "relu": bool(has_act)})

    # Final Linear(dim_inner, dim_out, bias=True)
    key, kw, kb = jax.random.split(key, 3)
    bound = 1.0 / math.sqrt(dim_inner)
    w = jax.random.uniform(kw, (dim_out, dim_inner), minval=-bound, maxval=bound,
                           dtype=dtype)
    b = jax.random.uniform(kb, (dim_out,), minval=-bound, maxval=bound,
                           dtype=dtype)
    layers.append({"w_kn": jnp.asarray(w.T), "b": b, "relu": False})
    return layers


def mlp_forward(params, x):
    for layer in params:
        x = pallas_linear(x, layer["w_kn"], layer["b"], apply_relu=layer["relu"])
    return x


def mlp_reference(params, x):
    for layer in params:
        x = jnp.dot(x, layer["w_kn"], precision=jax.lax.Precision.HIGHEST) + layer["b"]
        if layer["relu"]:
            x = jnp.maximum(x, 0.0)
    return x


if __name__ == "__main__":
    # Small shapes consistent with the module: a [batch, dim_in] feature tensor.
    batch, dim_in, dim_inner, dim_out = 16, 32, 64, 8
    num_layers = 3  # exercises the hidden ReLU path as well as the final plain Linear

    key = jax.random.PRNGKey(0)
    key, kx = jax.random.split(key)
    x = jax.random.normal(kx, (batch, dim_in), dtype=jnp.float32)

    params = init_mlp_params(key, dim_in, dim_out, dim_inner=dim_inner,
                             num_layers=num_layers, final_act=False)

    out = mlp_forward(params, x)
    out = jax.block_until_ready(out)

    ref = mlp_reference(params, x)
    assert out.shape == (batch, dim_out)
    assert jnp.allclose(out, ref, atol=5e-4, rtol=5e-4), "mismatch vs reference"

    print("KERNEL_OK")
</pallas_src>

<mosaic_0001>
module attributes {stable_mosaic.version = 11 : i64} {
  func.func @_linear_kernel(%arg0: i32, %arg1: i32, %arg2: i32, %arg3: memref<16x128xf32, #tpu.memory_space<vmem>>, %arg4: memref<128x128xf32, #tpu.memory_space<vmem>>, %arg5: memref<1x128xf32, #tpu.memory_space<vmem>>, %arg6: memref<16x128xf32, #tpu.memory_space<vmem>>, %arg7: memref<16x128xf32, #tpu.memory_space<vmem>>) attributes {dimension_semantics = [#tpu.dimension_semantics<parallel>, #tpu.dimension_semantics<parallel>, #tpu.dimension_semantics<arbitrary>], iteration_bounds = array<i64: 1, 1, 1>, scalar_prefetch = 0 : i64, scratch_operands = 1 : i64, tpu.core_type = #tpu.core_type<tc>, window_params = [{transform_indices = @transform_0, window_bounds = array<i64: 16, 128>}, {transform_indices = @transform_1, window_bounds = array<i64: 128, 128>}, {transform_indices = @transform_2, window_bounds = array<i64: 1, 128>}, {transform_indices = @transform_3, window_bounds = array<i64: 16, 128>}]} {
    %c0_i32 = arith.constant 0 : i32
    %0 = arith.cmpi eq, %arg2, %c0_i32 : i32
    %1 = arith.extui %0 : i1 to i32
    %c0_i32_0 = arith.constant 0 : i32
    %2 = arith.cmpi ne, %1, %c0_i32_0 : i32
    scf.if %2 {
      %cst_10 = arith.constant 0.000000e+00 : f32
      %12 = vector.broadcast %cst_10 : f32 to vector<16x128xf32>
      %c0_11 = arith.constant 0 : index
      %c0_12 = arith.constant 0 : index
      %13 = vector.load %arg7[%c0_11, %c0_12] : memref<16x128xf32, #tpu.memory_space<vmem>>, vector<16x128xf32>
      tpu.vector_store %arg7[%c0_11, %c0_12], %12 {strides = array<i32>} : memref<16x128xf32, #tpu.memory_space<vmem>>, vector<16x128xf32>,
    } else {
    }
    %c0 = arith.constant 0 : index
    %c0_1 = arith.constant 0 : index
    %3 = vector.load %arg7[%c0, %c0_1] : memref<16x128xf32, #tpu.memory_space<vmem>>, vector<16x128xf32>
    %c0_2 = arith.constant 0 : index
    %c0_3 = arith.constant 0 : index
    %4 = vector.load %arg3[%c0_2, %c0_3] : memref<16x128xf32, #tpu.memory_space<vmem>>, vector<16x128xf32>
    %c0_4 = arith.constant 0 : index
    %c0_5 = arith.constant 0 : index
    %5 = vector.load %arg4[%c0_4, %c0_5] : memref<128x128xf32, #tpu.memory_space<vmem>>, vector<128x128xf32>
    %cst = arith.constant dense<0.000000e+00> : vector<16x128xf32>
    %6 = tpu.matmul %4, %5, %cst {dimension_numbers = #tpu.dot_dimension_numbers<[1], [0], [0], [1], [0, 0, 1, 1], [], []>} : vector<16x128xf32>, vector<128x128xf32>, vector<16x128xf32> -> vector<16x128xf32>
    %7 = arith.addf %3, %6 : vector<16x128xf32>
    %c0_6 = arith.constant 0 : index
    %c0_7 = arith.constant 0 : index
    %8 = vector.load %arg7[%c0_6, %c0_7] : memref<16x128xf32, #tpu.memory_space<vmem>>, vector<16x128xf32>
    tpu.vector_store %arg7[%c0_6, %c0_7], %7 {strides = array<i32>} : memref<16x128xf32, #tpu.memory_space<vmem>>, vector<16x128xf32>,
    %c0_i32_8 = arith.constant 0 : i32
    %9 = arith.cmpi eq, %arg2, %c0_i32_8 : i32
    %10 = arith.extui %9 : i1 to i32
    %c0_i32_9 = arith.constant 0 : i32
    %11 = arith.cmpi ne, %10, %c0_i32_9 : i32
    scf.if %11 {
      %c0_10 = arith.constant 0 : index
      %c0_11 = arith.constant 0 : index
      %12 = vector.load %arg7[%c0_10, %c0_11] : memref<16x128xf32, #tpu.memory_space<vmem>>, vector<16x128xf32>
      %c0_12 = arith.constant 0 : index
      %c0_13 = arith.constant 0 : index
      %13 = vector.load %arg5[%c0_12, %c0_13] : memref<1x128xf32, #tpu.memory_space<vmem>>, vector<1x128xf32>
      %14 = vector.broadcast %13 : vector<1x128xf32> to vector<16x128xf32>
      %15 = arith.addf %12, %14 : vector<16x128xf32>
      %cst_14 = arith.constant 0.000000e+00 : f32
      %16 = vector.broadcast %cst_14 : f32 to vector<16x128xf32>
      %17 = arith.maximumf %15, %16 : vector<16x128xf32>
      %c0_15 = arith.constant 0 : index
      %c0_16 = arith.constant 0 : index
      %18 = vector.load %arg6[%c0_15, %c0_16] : memref<16x128xf32, #tpu.memory_space<vmem>>, vector<16x128xf32>
      tpu.vector_store %arg6[%c0_15, %c0_16], %17 {strides = array<i32>} : memref<16x128xf32, #tpu.memory_space<vmem>>, vector<16x128xf32>,
    } else {
    }
    return
  }
  func.func @transform_0(%arg0: i32, %arg1: i32, %arg2: i32) -> (i32, i32) {
    %c0_i32 = arith.constant 0 : i32
    return %arg0, %arg2 : i32, i32
  }
  func.func @transform_1(%arg0: i32, %arg1: i32, %arg2: i32) -> (i32, i32) {
    %c0_i32 = arith.constant 0 : i32
    return %arg2, %arg1 : i32, i32
  }
  func.func @transform_2(%arg0: i32, %arg1: i32, %arg2: i32) -> (i32, i32) {
    %c0_i32 = arith.constant 0 : i32
    %c0_i32_0 = arith.constant 0 : i32
    return %c0_i32, %arg1 : i32, i32
  }
  func.func @transform_3(%arg0: i32, %arg1: i32, %arg2: i32) -> (i32, i32) {
    %c0_i32 = arith.constant 0 : i32
    return %arg0, %arg1 : i32, i32
  }
}

</mosaic_0001>

<bundles_post_ra>
// kernel: pallas_linear.1
= control target key start
LH: loop header
LB: loop body
LE: loop exit
PB: predicated region body
PF: predicated region fallthrough
CT: control target
= control target key end

     0   :  { %s316_s0 = inlined_call_operand.vmem [shape: f32[16,128], index: 0, kind: input, shape index: {}]   ;;  %s317_s1 = inlined_call_operand.vmem [shape: f32[128,128], index: 1, kind: input, shape index: {}]   ;;  %s318_s2 = inlined_call_operand.vmem [shape: f32[1,128], index: 2, kind: input, shape index: {}]   ;;  %s319_s3 = inlined_call_operand.hbm [shape: f32[16,128], index: 3, kind: output, shape index: {}]  }
   0x1   :  { %v40_v0 = vld [vmem:[%s317_s1 + $0x78] sm:$0xff]  ;;  %v39_v1 = vld [vmem:[%s317_s1 + $0x70] sm:$0xff]  ;;  %v38_v2 = vld [vmem:[%s317_s1 + $0x68] sm:$0xff] }
   0x2   :  { %173 = vmatprep.subr.mxu0 %v40_v0  ;;  %v37_v3 = vld [vmem:[%s317_s1 + $0x60] sm:$0xff]  ;;  %v36_v5 = vld [vmem:[%s317_s1 + $0x58] sm:$0xff] }
   0x3   :  { %174 = vmatpush3.msra.mxu0 %v40_v0  ;;  %v23_v4 = vld [vmem:[%s316_s0] sm:$0xff] }
   0x4   :  { %175 = vmatprep.subr.mxu0 %v39_v1  ;;  %205 = vmatprep.mubr.f32.mxu0 %v23_v4 }
   0x5   :  { %176 = vmatpush3.msra.mxu0 %v39_v1 }
   0x6   :  { %177 = vmatprep.subr.mxu0 %v38_v2 }
   0x7   :  { %178 = vmatpush3.msra.mxu0 %v38_v2 }
   0x8   :  { %8 = vsyncpa [#allocation4], 0  ;;  %179 = vmatprep.subr.mxu0 %v37_v3  ;;  %v35_v6 = vld [vmem:[%s317_s1 + $0x50] sm:$0xff]  ;;  %v34_v7 = vld [vmem:[%s317_s1 + $0x48] sm:$0xff]  ;;  %s233_s23 = smov [#allocation3]  }
   0x9   :  { %180 = vmatpush3.msra.mxu0 %v37_v3  ;;  %v33_v8 = vld [vmem:[%s317_s1 + $0x40] sm:$0xff]  ;;  %v32_v9 = vld [vmem:[%s317_s1 + $0x38] sm:$0xff]  ;;  %v31_v10 = vld [vmem:[%s317_s1 + $0x30] sm:$0xff]  ;;  %s143_s24 = sshll.u32 %s233_s23, 4  ;;  %s144_s24 = int_to_ptr.vmem [resolvable:$true] %s143_s24 }
   0xa   :  { %181 = vmatprep.subr.mxu0 %v36_v5  ;;  %v30_v11 = vld [vmem:[%s317_s1 + $0x28] sm:$0xff]  ;;  %v29_v12 = vld [vmem:[%s317_s1 + $0x20] sm:$0xff]  ;;  %v28_v13 = vld [vmem:[%s317_s1 + $0x18] sm:$0xff]  ;;  %p216_p1 = scmp.lt.s32.totalorder %s144_s24, %s144_s24 }
   0xb   :  { %182 = vmatpush3.msra.mxu0 %v36_v5  ;;  %v27_v14 = vld [vmem:[%s317_s1 + $0x10] sm:$0xff]  ;;  %v26_v15 = vld [vmem:[%s317_s1 + $0x8] sm:$0xff]  ;;  %v25_v16 = vld [vmem:[%s317_s1] sm:$0xff]  ;;  %s211_s1 = scalar_lea.vmem %s144_s24, 256 }
   0xc   :  { %183 = vmatprep.subr.mxu0 %v35_v6  ;;  %v24_v17 = vld [vmem:[%s316_s0 + $0x8] sm:$0xff]  ;;  %v154_v18 = vld [vmem:[%s318_s2] ss:$0 sm:$0xff]  ;;  %p212_p0 = scmp.ne.s32.totalorder %s144_s24, %s211_s1  ;;  %p217_p2 = scmp.lt.s32.totalorder %s211_s1, %s211_s1 }
   0xd   :  { %184 = vmatpush3.msra.mxu0 %v35_v6 }
   0xe   :  { %185 = vmatprep.subr.mxu0 %v34_v7  ;;  %p218_p3 = por %p217_p2, %p216_p1 }
   0xf   :  { %186 = vmatpush3.msra.mxu0 %v34_v7 }
  0x10   :  { %187 = vmatprep.subr.mxu0 %v33_v8  ;;  %p219_p4 = pnand %p218_p3, %p212_p0 }
  0x11   :  { %188 = vmatpush3.msra.mxu0 %v33_v8 }
  0x12   :  { %189 = vmatprep.subr.mxu0 %v32_v9 }
  0x13   :  { %190 = vmatpush3.msra.mxu0 %v32_v9 }
  0x14   :  { %191 = vmatprep.subr.mxu0 %v31_v10 }
  0x15   :  { %192 = vmatpush3.msra.mxu0 %v31_v10 }
  0x16   :  { %193 = vmatprep.subr.mxu0 %v30_v11 }
  0x17   :  { %194 = vmatpush3.msra.mxu0 %v30_v11 }
  0x18   :  { %195 = vmatprep.subr.mxu0 %v29_v12 }
  0x19   :  { %196 = vmatpush3.msra.mxu0 %v29_v12 }
  0x1a   :  { %197 = vmatprep.subr.mxu0 %v28_v13 }
  0x1b   :  { %198 = vmatpush3.msra.mxu0 %v28_v13 }
  0x1c   :  { %199 = vmatprep.subr.mxu0 %v27_v14 }
  0x1d   :  { %200 = vmatpush3.msra.mxu0 %v27_v14 }
  0x1e   :  { %201 = vmatprep.subr.mxu0 %v26_v15 }
  0x1f   :  { %202 = vmatpush3.msra.mxu0 %v26_v15 }
  0x20   :  { %203 = vmatprep.subr.mxu0 %v25_v16 }
  0x21   :  { %204 = vmatpush3.msra.mxu0 %v25_v16 }
  0x22   :  { %206 = vmatmul.mubr.f32.vlgmr.msra.gmra.mxu0 %v24_v17 }
  0xe2   :  { %v207_v19 = vpop.f32.mrf.mxu0 }
  0xe3   :  { %v133_v20 = vadd.f32 %v207_v19, %v154_v18 }
  0xe4   :  { %v107_v21 = vpop.f32.mrf.mxu0 }
  0xe5   :  { %v135_v22 = vmax.f32 %v133_v20, 0.0  ;;  %v132_v23 = vadd.f32 %v154_v18, %v107_v21 }
  0xe7   :  { %137 = vst [vmem:[#allocation3 + $0x8] sm:$0xff] %v135_v22  ;;  %v134_v24 = vmax.f32 %v132_v23, 0.0 }
  0xe9   :  { %136 = vst [vmem:[#allocation3] sm:$0xff] %v134_v24 }
  0xea   :  { %222 = shalt.err (!%p219_p4)
}
  0xeb   :  { %s234_s0 = smov 128   ;;  %s235_s2 = smov 8  }
  0xec   :  { %149 = dma.vmem_to_hbm [thread:$0]  %s144_s24, 256, %s319_s3, [#allocation4], %s234_s0, %s234_s0, %s235_s2  }
  0xed   :  { %231 = dma.done.wait [#allocation4], 256  }
  0xee   :  { %232 = vsyncadd [#allocation4], 4294967040 }
  0xef   :  { %153 = vsyncpa [#allocation4], 1 }

</bundles_post_ra>
